<compile_context>
chip_gen: v5e
topology: v5e:2x2
jax: 0.10.0
libtpu: 0.0.40
codegen_flags: <defaults>
</compile_context>

<pallas_src>
import functools

import jax
import jax.numpy as jnp
from jax import lax
from jax.experimental import pallas as pl
from jax.experimental.pallas import tpu as pltpu

L_SEQ = 101                      # sequence length fixed by the module
LP = 128                         # lane-padded sequence length (TPU lane width)
BETA = 6.0
COMPUTE_DTYPE = jnp.bfloat16     # MXU operand dtype (accumulation stays f32)


# ------------------------------ fused kernel --------------------------------

def fused_deeponet_kernel(*refs, n_conv, K, B, beta, L, Lp,
                          n_branch_rest, n_trunk, p):
    # input refs, in order:
    #   x0      : (B, 3, Lp) f32     input slab (g_x, g_y, y), zero lane halo
    #   t_in    : (Nc, 2)   f32      trunk input
    #   per conv layer: w (K*Cout, Cin) bf16 (rows = kk*Cout + o), b (Cout, 1) f32
    #   wf      : (C, Lp, 2p) bf16   first branch linear, flatten-folded, halo rows zero
    #   bf      : (1, 2p)  f32
    #   per remaining branch linear: w (2p, 2p) bf16, b (1, 2p) f32
    #   per trunk linear:            w (din, dout) bf16, b (1, dout) f32
    # output ref: out (B, 2*Nc) f32  = [u | v]
    it = iter(refs)
    x0_ref = next(it)
    t_in_ref = next(it)
    conv_refs = [(next(it), next(it)) for _ in range(n_conv)]
    wf_ref = next(it)
    bf_ref = next(it)
    branch_refs = [(next(it), next(it)) for _ in range(n_branch_rest)]
    trunk_refs = [(next(it), next(it)) for _ in range(n_trunk)]
    out_ref = next(it)

    f32 = jnp.float32
    cd = COMPUTE_DTYPE
    pad = K // 2
    # real samples live in lanes [0, L); the halo [L, Lp) doubles as conv zero padding
    lane_mask = (lax.broadcasted_iota(jnp.int32, (1, 1, Lp), 2) < L).astype(f32)

    # ----- branch conv stack: 1 batched MXU matmul + K XLU rolls per layer -----
    act = x0_ref[...]                                   # (B, Cin, Lp) f32, halo zero
    for li, (w_ref, bc_ref) in enumerate(conv_refs):
        c_out = bc_ref.shape[0]
        wb = jnp.broadcast_to(w_ref[...], (B,) + tuple(w_ref.shape))  # (B, K*Cout, Cin)
        # single channel-mix matmul for all K taps; batch is a true batch dim
        z = lax.dot_general(wb, act.astype(cd),
                            (((2,), (1,)), ((0,), (0,))),
                            preferred_element_type=f32)               # (B, K*Cout, Lp)
        # apply the K kernel taps as lane rotations of the per-tap blocks and sum;
        # roll commutes with the per-lane channel mix, and the zero halo supplies
        # the conv zero padding (wrapped lanes land in / come from the halo).
        y = None
        for kk in range(K):
            zk = z[:, kk * c_out:(kk + 1) * c_out, :]                  # (B, Cout, Lp)
            shift = (pad - kk) % Lp
            if shift:
                zk = pltpu.roll(zk, shift=shift, axis=2)
            y = zk if y is None else y + zk
        y = jnp.tanh(y + bc_ref[...])                                  # f32 VPU/EUP math
        if li < n_conv - 1:
            y = y * lane_mask          # re-zero halo only where the next roll needs it
        act = y                                                        # (B, Cout, Lp) f32

    # -------- flatten (folded into wf) + first branch linear --------
    C = act.shape[1]
    h = jnp.dot(act[:, 0, :].astype(cd), wf_ref[0], preferred_element_type=f32)
    for c in range(1, C):
        h = h + jnp.dot(act[:, c, :].astype(cd), wf_ref[c],
                        preferred_element_type=f32)
    h = h + bf_ref[...]
    if n_branch_rest > 0:              # tanh after every branch linear except the last
        h = jnp.tanh(h)

    # -------------------------- remaining branch MLP --------------------------
    for i, (w_ref, b_ref) in enumerate(branch_refs):
        h = jnp.dot(h.astype(cd), w_ref[...], preferred_element_type=f32) + b_ref[...]
        if i < n_branch_rest - 1:
            h = jnp.tanh(h)

    # -------------------------------- trunk MLP -------------------------------
    t_in = t_in_ref[...]                                # (Nc, 2) f32
    t = t_in
    for i, (w_ref, b_ref) in enumerate(trunk_refs):
        t = jnp.dot(t.astype(cd), w_ref[...], preferred_element_type=f32) + b_ref[...]
        if i < n_trunk - 1:
            t = jnp.tanh(t)

    # -------------------------------- combine ---------------------------------
    # r multiplies along the collocation axis -> apply it on the trunk side.
    r = 1.0 - jnp.exp(-t_in[:, 0:1] / beta)             # (Nc, 1)
    t_scaled = t * r
    b_u, b_v = h[:, :p], h[:, p:]
    t_u, t_v = t_scaled[:, :p], t_scaled[:, p:]
    dn = (((1,), (1,)), ((), ()))                       # (B,p) x (Nc,p) -> (B,Nc)
    u = lax.dot_general(b_u, t_u, dn, preferred_element_type=f32)
    v = lax.dot_general(b_v, t_v, dn, preferred_element_type=f32)
    out_ref[...] = jnp.concatenate([u, v], axis=-1)     # single (B, 2*Nc) store


# ----------------------- one-time parameter preparation ----------------------

def prepare_params(params, *, compute_dtype=COMPUTE_DTYPE):
    """Hoisted, one-time layout / dtype prep.  Reuse the result across calls."""
    f32 = jnp.float32
    prepped = {"conv": [], "branch_rest": [], "trunk": []}

    for (w, b) in params["branch_conv"]:                 # w: (Cout, Cin, K) torch layout
        c_out, c_in, K = w.shape
        # tap-major flattening: row kk*Cout + o  <-  W[o, c, kk]
        w_all = jnp.transpose(w.astype(f32), (2, 0, 1)).reshape(K * c_out, c_in)
        prepped["conv"].append((w_all.astype(compute_dtype),
                                b.astype(f32).reshape(c_out, 1)))

    C = params["branch_conv"][-1][0].shape[0]
    w1, b1 = params["branch_lin"][0]                     # (C*101, 2p) stored (in, out)
    two_p = w1.shape[1]
    # fold torch Flatten (index c*101 + l) + zero rows for the lane halo
    wf = jnp.zeros((C, LP, two_p), f32).at[:, :L_SEQ, :].set(
        w1.astype(f32).reshape(C, L_SEQ, two_p))
    prepped["wf"] = wf.astype(compute_dtype)
    prepped["bf"] = b1.reshape(1, -1).astype(f32)

    for (w, b) in params["branch_lin"][1:]:
        prepped["branch_rest"].append((w.astype(compute_dtype),
                                       b.reshape(1, -1).astype(f32)))
    for (w, b) in params["trunk_lin"]:
        prepped["trunk"].append((w.astype(compute_dtype),
                                 b.reshape(1, -1).astype(f32)))
    return prepped


# ------------------------------ forward wrapper ------------------------------

def conv_deeponet_forward(prepped, branch_input, trunk_input, *, beta=BETA):
    f32 = jnp.float32
    B = branch_input.shape[0]
    Nc = trunk_input.shape[0]
    L, Lp = L_SEQ, LP

    # static metadata derived from prepared shapes / pytree structure
    c_out0 = prepped["conv"][0][1].shape[0]
    K = prepped["conv"][0][0].shape[0] // c_out0
    p = prepped["bf"].shape[1] // 2
    assert K % 2 == 1 and K // 2 <= Lp - L, \
        "roll-based conv padding requires odd K with K//2 <= lane halo width"

    # input slab (B, 3, Lp): channels (g_x, g_y, y); zero lane halo = conv padding
    g_x = branch_input[:, :L].astype(f32)
    g_y = branch_input[:, L:].astype(f32)
    y_coords = jnp.broadcast_to(jnp.linspace(0.0, 1.0, L, dtype=f32), (B, L))
    x0 = jnp.stack((g_x, g_y, y_coords), axis=1)         # (B, 3, L)
    x0 = jnp.pad(x0, ((0, 0), (0, 0), (0, Lp - L)))      # (B, 3, Lp)

    inputs = [x0, trunk_input.astype(f32)]
    for wb_ in prepped["conv"]:
        inputs += list(wb_)
    inputs += [prepped["wf"], prepped["bf"]]
    for wb_ in prepped["branch_rest"]:
        inputs += list(wb_)
    for wb_ in prepped["trunk"]:
        inputs += list(wb_)

    kern = functools.partial(
        fused_deeponet_kernel,
        n_conv=len(prepped["conv"]), K=K, B=B, beta=beta, L=L, Lp=Lp,
        n_branch_rest=len(prepped["branch_rest"]),
        n_trunk=len(prepped["trunk"]), p=p)

    vmem = pl.BlockSpec(memory_space=pltpu.MemorySpace.VMEM)
    out = pl.pallas_call(
        kern,
        out_shape=jax.ShapeDtypeStruct((B, 2 * Nc), f32),
        in_specs=[vmem] * len(inputs),
        out_specs=vmem,
    )(*inputs)
    return out[:, :Nc], out[:, Nc:]


# --------------------------- parameter construction --------------------------

def init_params(key, n_branch_conv, n_branch_channels, kernel_size,
                n_branch_nonlinear, n_trunk_nonlinear, p):
    def uniform(key, shape, fan_in):
        bound = 1.0 / jnp.sqrt(jnp.float32(fan_in))
        return jax.random.uniform(key, shape, jnp.float32, -bound, bound)

    keys = iter(jax.random.split(key, 64))
    params = {"branch_conv": [], "branch_lin": [], "trunk_lin": []}

    for i in range(n_branch_conv):
        in_ch = 3 if i == 0 else n_branch_channels
        fan = in_ch * kernel_size
        w = uniform(next(keys), (n_branch_channels, in_ch, kernel_size), fan)
        b = uniform(next(keys), (n_branch_channels,), fan)
        params["branch_conv"].append((w, b))

    n_hidden = n_branch_channels * L_SEQ
    dims = [n_hidden] + [2 * p] * (n_branch_nonlinear + 1)
    for i in range(n_branch_nonlinear + 1):
        din, dout = dims[i], dims[i + 1]
        params["branch_lin"].append((uniform(next(keys), (din, dout), din),
                                     uniform(next(keys), (dout,), din)))

    tdims = [2] + [256] * n_trunk_nonlinear + [2 * p]
    for i in range(n_trunk_nonlinear + 1):
        din, dout = tdims[i], tdims[i + 1]
        params["trunk_lin"].append((uniform(next(keys), (din, dout), din),
                                    uniform(next(keys), (dout,), din)))
    return params


# ----------------------------- pure-JAX reference ----------------------------

def _ref_conv(x, w, b):
    C_out, C_in, K = w.shape
    pad = K // 2
    L = x.shape[2]
    xp = jnp.pad(x, ((0, 0), (0, 0), (pad, pad)))
    out = jnp.zeros((C_out, x.shape[1], L), jnp.float32)
    for k in range(K):
        out = out + jnp.einsum("oc,cbl->obl", w[:, :, k], xp[:, :, k:k + L])
    return jnp.tanh(out + b[:, None, None])


def ref_forward(params, branch_input, trunk_input, *, p):
    B = branch_input.shape[0]
    y_lin = jnp.linspace(0.0, 1.0, L_SEQ, dtype=branch_input.dtype)
    y_coords = jnp.broadcast_to(y_lin, (B, L_SEQ))
    x = jnp.stack((branch_input[:, :L_SEQ], branch_input[:, L_SEQ:], y_coords), axis=0)
    for (w, b) in params["branch_conv"]:
        x = _ref_conv(x, w, b)
    h = jnp.transpose(x, (1, 0, 2)).reshape(B, -1)
    n_bl = len(params["branch_lin"])
    for i, (w, b) in enumerate(params["branch_lin"]):
        h = h @ w + b
        if i < n_bl - 1:
            h = jnp.tanh(h)
    t = trunk_input
    n_tl = len(params["trunk_lin"])
    for i, (w, b) in enumerate(params["trunk_lin"]):
        t = t @ w + b
        if i < n_tl - 1:
            t = jnp.tanh(t)
    b_u, b_v = h[:, :p], h[:, p:]
    t_u, t_v = t[:, :p], t[:, p:]
    u_hat = b_u @ t_u.T
    v_hat = b_v @ t_v.T
    r = 1.0 - jnp.exp(-trunk_input[:, 0] / BETA)[None, :]
    return r * u_hat, r * v_hat


# ----------------------------------- main ------------------------------------

if __name__ == "__main__":
    # small, module-consistent configuration
    n_branch_conv = 2
    n_branch_channels = 4
    kernel_size = 5          # odd -> padding=K//2 preserves L=101 (as the module requires)
    n_branch_nonlinear = 2
    n_trunk_nonlinear = 2
    p = 16
    batch = 2
    n_coll = 8

    key = jax.random.PRNGKey(0)
    k_par, k_b, k_t = jax.random.split(key, 3)
    params = init_params(k_par, n_branch_conv, n_branch_channels, kernel_size,
                         n_branch_nonlinear, n_trunk_nonlinear, p)

    branch_input = jax.random.normal(k_b, (batch, 2 * L_SEQ), jnp.float32)   # (2, 202)
    trunk_input = jax.random.uniform(k_t, (n_coll, 2), jnp.float32)          # (8, 2)

    prepped = prepare_params(params)   # one-time layout/dtype prep, reused across calls
    fwd = jax.jit(conv_deeponet_forward)
    u, v = fwd(prepped, branch_input, trunk_input)
    jax.block_until_ready((u, v))

    u_ref, v_ref = ref_forward(params, branch_input, trunk_input, p=p)
    assert u.shape == (batch, n_coll) and v.shape == (batch, n_coll)
    # tolerance covers bf16 MXU operands vs the f32 reference
    assert jnp.allclose(u, u_ref, rtol=3e-2, atol=3e-2), float(jnp.max(jnp.abs(u - u_ref)))
    assert jnp.allclose(v, v_ref, rtol=3e-2, atol=3e-2), float(jnp.max(jnp.abs(v - v_ref)))

    print("KERNEL_OK")
</pallas_src>

<mosaic_0001>
module attributes {stable_mosaic.version = 11 : i64} {
  func.func @fused_deeponet_kernel(%arg0: memref<2x3x128xf32, #tpu.memory_space<vmem>>, %arg1: memref<8x2xf32, #tpu.memory_space<vmem>>, %arg2: memref<20x3xbf16, #tpu.memory_space<vmem>>, %arg3: memref<4x1xf32, #tpu.memory_space<vmem>>, %arg4: memref<20x4xbf16, #tpu.memory_space<vmem>>, %arg5: memref<4x1xf32, #tpu.memory_space<vmem>>, %arg6: memref<4x128x32xbf16, #tpu.memory_space<vmem>>, %arg7: memref<1x32xf32, #tpu.memory_space<vmem>>, %arg8: memref<32x32xbf16, #tpu.memory_space<vmem>>, %arg9: memref<1x32xf32, #tpu.memory_space<vmem>>, %arg10: memref<32x32xbf16, #tpu.memory_space<vmem>>, %arg11: memref<1x32xf32, #tpu.memory_space<vmem>>, %arg12: memref<2x256xbf16, #tpu.memory_space<vmem>>, %arg13: memref<1x256xf32, #tpu.memory_space<vmem>>, %arg14: memref<256x256xbf16, #tpu.memory_space<vmem>>, %arg15: memref<1x256xf32, #tpu.memory_space<vmem>>, %arg16: memref<256x32xbf16, #tpu.memory_space<vmem>>, %arg17: memref<1x32xf32, #tpu.memory_space<vmem>>, %arg18: memref<2x16xf32, #tpu.memory_space<vmem>>) attributes {dimension_semantics = [], scalar_prefetch = 0 : i64, scratch_operands = 0 : i64, tpu.core_type = #tpu.core_type<tc>} {
    %0 = tpu.iota {dimensions = array<i32: 2>} : vector<1x1x128xi32>
    %c101_i32 = arith.constant 101 : i32
    %1 = vector.broadcast %c101_i32 : i32 to vector<1x1x128xi32>
    %2 = arith.cmpi slt, %0, %1 : vector<1x1x128xi32>
    %3 = arith.extui %2 : vector<1x1x128xi1> to vector<1x1x128xi32>
    %4 = arith.sitofp %3 : vector<1x1x128xi32> to vector<1x1x128xf32>
    %c0 = arith.constant 0 : index
    %c0_0 = arith.constant 0 : index
    %c0_1 = arith.constant 0 : index
    %5 = vector.load %arg0[%c0, %c0_0, %c0_1] : memref<2x3x128xf32, #tpu.memory_space<vmem>>, vector<2x3x128xf32>
    %c0_2 = arith.constant 0 : index
    %c0_3 = arith.constant 0 : index
    %6 = vector.load %arg2[%c0_2, %c0_3] : memref<20x3xbf16, #tpu.memory_space<vmem>>, vector<20x3xbf16>
    %7 = vector.shape_cast %6 : vector<20x3xbf16> to vector<1x20x3xbf16>
    %8 = vector.broadcast %7 : vector<1x20x3xbf16> to vector<2x20x3xbf16>
    %9 = arith.truncf %5 : vector<2x3x128xf32> to vector<2x3x128xbf16>
    %cst = arith.constant dense<0.000000e+00> : vector<2x20x128xf32>
    %10 = tpu.matmul %8, %9, %cst {dimension_numbers = #tpu.dot_dimension_numbers<[2], [1], [1], [2], [0, 0, 0, 1, 1, 2], [0], [0]>} : vector<2x20x3xbf16>, vector<2x3x128xbf16>, vector<2x20x128xf32> -> vector<2x20x128xf32>
    %11 = vector.extract_strided_slice %10 {offsets = [0, 0, 0], sizes = [2, 4, 128], strides = [1, 1, 1]} : vector<2x20x128xf32> to vector<2x4x128xf32>
    %c2_i32 = arith.constant 2 : i32
    %12 = tpu.dynamic_rotate %11 by %c2_i32 dim 2 : vector<2x4x128xf32>, i32 -> vector<2x4x128xf32>
    %13 = vector.extract_strided_slice %10 {offsets = [0, 4, 0], sizes = [2, 4, 128], strides = [1, 1, 1]} : vector<2x20x128xf32> to vector<2x4x128xf32>
    %c1_i32 = arith.constant 1 : i32
    %14 = tpu.dynamic_rotate %13 by %c1_i32 dim 2 : vector<2x4x128xf32>, i32 -> vector<2x4x128xf32>
    %15 = arith.addf %12, %14 : vector<2x4x128xf32>
    %16 = vector.extract_strided_slice %10 {offsets = [0, 8, 0], sizes = [2, 4, 128], strides = [1, 1, 1]} : vector<2x20x128xf32> to vector<2x4x128xf32>
    %17 = arith.addf %15, %16 : vector<2x4x128xf32>
    %18 = vector.extract_strided_slice %10 {offsets = [0, 12, 0], sizes = [2, 4, 128], strides = [1, 1, 1]} : vector<2x20x128xf32> to vector<2x4x128xf32>
    %c127_i32 = arith.constant 127 : i32
    %19 = tpu.dynamic_rotate %18 by %c127_i32 dim 2 : vector<2x4x128xf32>, i32 -> vector<2x4x128xf32>
    %20 = arith.addf %17, %19 : vector<2x4x128xf32>
    %21 = vector.extract_strided_slice %10 {offsets = [0, 16, 0], sizes = [2, 4, 128], strides = [1, 1, 1]} : vector<2x20x128xf32> to vector<2x4x128xf32>
    %c126_i32 = arith.constant 126 : i32
    %22 = tpu.dynamic_rotate %21 by %c126_i32 dim 2 : vector<2x4x128xf32>, i32 -> vector<2x4x128xf32>
    %23 = arith.addf %20, %22 : vector<2x4x128xf32>
    %c0_4 = arith.constant 0 : index
    %c0_5 = arith.constant 0 : index
    %24 = vector.load %arg3[%c0_4, %c0_5] : memref<4x1xf32, #tpu.memory_space<vmem>>, vector<4x1xf32>
    %25 = vector.shape_cast %24 : vector<4x1xf32> to vector<1x4x1xf32>
    %26 = vector.broadcast %25 : vector<1x4x1xf32> to vector<2x4x128xf32>
    %27 = arith.addf %23, %26 : vector<2x4x128xf32>
    %28 = math.tanh %27 : vector<2x4x128xf32>
    %29 = vector.broadcast %4 : vector<1x1x128xf32> to vector<2x4x128xf32>
    %30 = arith.mulf %28, %29 : vector<2x4x128xf32>
    %c0_6 = arith.constant 0 : index
    %c0_7 = arith.constant 0 : index
    %31 = vector.load %arg4[%c0_6, %c0_7] : memref<20x4xbf16, #tpu.memory_space<vmem>>, vector<20x4xbf16>
    %32 = vector.shape_cast %31 : vector<20x4xbf16> to vector<1x20x4xbf16>
    %33 = vector.broadcast %32 : vector<1x20x4xbf16> to vector<2x20x4xbf16>
    %34 = arith.truncf %30 : vector<2x4x128xf32> to vector<2x4x128xbf16>
    %cst_8 = arith.constant dense<0.000000e+00> : vector<2x20x128xf32>
    %35 = tpu.matmul %33, %34, %cst_8 {dimension_numbers = #tpu.dot_dimension_numbers<[2], [1], [1], [2], [0, 0, 0, 1, 1, 2], [0], [0]>} : vector<2x20x4xbf16>, vector<2x4x128xbf16>, vector<2x20x128xf32> -> vector<2x20x128xf32>
    %36 = vector.extract_strided_slice %35 {offsets = [0, 0, 0], sizes = [2, 4, 128], strides = [1, 1, 1]} : vector<2x20x128xf32> to vector<2x4x128xf32>
    %c2_i32_9 = arith.constant 2 : i32
    %37 = tpu.dynamic_rotate %36 by %c2_i32_9 dim 2 : vector<2x4x128xf32>, i32 -> vector<2x4x128xf32>
    %38 = vector.extract_strided_slice %35 {offsets = [0, 4, 0], sizes = [2, 4, 128], strides = [1, 1, 1]} : vector<2x20x128xf32> to vector<2x4x128xf32>
    %c1_i32_10 = arith.constant 1 : i32
    %39 = tpu.dynamic_rotate %38 by %c1_i32_10 dim 2 : vector<2x4x128xf32>, i32 -> vector<2x4x128xf32>
    %40 = arith.addf %37, %39 : vector<2x4x128xf32>
    %41 = vector.extract_strided_slice %35 {offsets = [0, 8, 0], sizes = [2, 4, 128], strides = [1, 1, 1]} : vector<2x20x128xf32> to vector<2x4x128xf32>
    %42 = arith.addf %40, %41 : vector<2x4x128xf32>
    %43 = vector.extract_strided_slice %35 {offsets = [0, 12, 0], sizes = [2, 4, 128], strides = [1, 1, 1]} : vector<2x20x128xf32> to vector<2x4x128xf32>
    %c127_i32_11 = arith.constant 127 : i32
    %44 = tpu.dynamic_rotate %43 by %c127_i32_11 dim 2 : vector<2x4x128xf32>, i32 -> vector<2x4x128xf32>
    %45 = arith.addf %42, %44 : vector<2x4x128xf32>
    %46 = vector.extract_strided_slice %35 {offsets = [0, 16, 0], sizes = [2, 4, 128], strides = [1, 1, 1]} : vector<2x20x128xf32> to vector<2x4x128xf32>
    %c126_i32_12 = arith.constant 126 : i32
    %47 = tpu.dynamic_rotate %46 by %c126_i32_12 dim 2 : vector<2x4x128xf32>, i32 -> vector<2x4x128xf32>
    %48 = arith.addf %45, %47 : vector<2x4x128xf32>
    %c0_13 = arith.constant 0 : index
    %c0_14 = arith.constant 0 : index
    %49 = vector.load %arg5[%c0_13, %c0_14] : memref<4x1xf32, #tpu.memory_space<vmem>>, vector<4x1xf32>
    %50 = vector.shape_cast %49 : vector<4x1xf32> to vector<1x4x1xf32>
    %51 = vector.broadcast %50 : vector<1x4x1xf32> to vector<2x4x128xf32>
    %52 = arith.addf %48, %51 : vector<2x4x128xf32>
    %53 = math.tanh %52 : vector<2x4x128xf32>
    %54 = vector.extract_strided_slice %53 {offsets = [0, 0, 0], sizes = [2, 1, 128], strides = [1, 1, 1]} : vector<2x4x128xf32> to vector<2x1x128xf32>
    %55 = vector.shape_cast %54 : vector<2x1x128xf32> to vector<2x128xf32>
    %56 = arith.truncf %55 : vector<2x128xf32> to vector<2x128xbf16>
    %c0_15 = arith.constant 0 : index
    %c0_16 = arith.constant 0 : index
    %c0_17 = arith.constant 0 : index
    %57 = vector.load %arg6[%c0_15, %c0_16, %c0_17] : memref<4x128x32xbf16, #tpu.memory_space<vmem>>, vector<1x128x32xbf16>
    %58 = vector.shape_cast %57 : vector<1x128x32xbf16> to vector<128x32xbf16>
    %cst_18 = arith.constant dense<0.000000e+00> : vector<2x32xf32>
    %59 = tpu.matmul %56, %58, %cst_18 {dimension_numbers = #tpu.dot_dimension_numbers<[1], [0], [0], [1], [0, 0, 1, 1], [], []>} : vector<2x128xbf16>, vector<128x32xbf16>, vector<2x32xf32> -> vector<2x32xf32>
    %60 = vector.extract_strided_slice %53 {offsets = [0, 1, 0], sizes = [2, 1, 128], strides = [1, 1, 1]} : vector<2x4x128xf32> to vector<2x1x128xf32>
    %61 = vector.shape_cast %60 : vector<2x1x128xf32> to vector<2x128xf32>
    %62 = arith.truncf %61 : vector<2x128xf32> to vector<2x128xbf16>
    %c1 = arith.constant 1 : index
    %c0_19 = arith.constant 0 : index
    %c0_20 = arith.constant 0 : index
    %63 = vector.load %arg6[%c1, %c0_19, %c0_20] : memref<4x128x32xbf16, #tpu.memory_space<vmem>>, vector<1x128x32xbf16>
    %64 = vector.shape_cast %63 : vector<1x128x32xbf16> to vector<128x32xbf16>
    %cst_21 = arith.constant dense<0.000000e+00> : vector<2x32xf32>
    %65 = tpu.matmul %62, %64, %cst_21 {dimension_numbers = #tpu.dot_dimension_numbers<[1], [0], [0], [1], [0, 0, 1, 1], [], []>} : vector<2x128xbf16>, vector<128x32xbf16>, vector<2x32xf32> -> vector<2x32xf32>
    %66 = arith.addf %59, %65 : vector<2x32xf32>
    %67 = vector.extract_strided_slice %53 {offsets = [0, 2, 0], sizes = [2, 1, 128], strides = [1, 1, 1]} : vector<2x4x128xf32> to vector<2x1x128xf32>
    %68 = vector.shape_cast %67 : vector<2x1x128xf32> to vector<2x128xf32>
    %69 = arith.truncf %68 : vector<2x128xf32> to vector<2x128xbf16>
    %c2 = arith.constant 2 : index
    %c0_22 = arith.constant 0 : index
    %c0_23 = arith.constant 0 : index
    %70 = vector.load %arg6[%c2, %c0_22, %c0_23] : memref<4x128x32xbf16, #tpu.memory_space<vmem>>, vector<1x128x32xbf16>
    %71 = vector.shape_cast %70 : vector<1x128x32xbf16> to vector<128x32xbf16>
    %cst_24 = arith.constant dense<0.000000e+00> : vector<2x32xf32>
    %72 = tpu.matmul %69, %71, %cst_24 {dimension_numbers = #tpu.dot_dimension_numbers<[1], [0], [0], [1], [0, 0, 1, 1], [], []>} : vector<2x128xbf16>, vector<128x32xbf16>, vector<2x32xf32> -> vector<2x32xf32>
    %73 = arith.addf %66, %72 : vector<2x32xf32>
    %74 = vector.extract_strided_slice %53 {offsets = [0, 3, 0], sizes = [2, 1, 128], strides = [1, 1, 1]} : vector<2x4x128xf32> to vector<2x1x128xf32>
    %75 = vector.shape_cast %74 : vector<2x1x128xf32> to vector<2x128xf32>
    %76 = arith.truncf %75 : vector<2x128xf32> to vector<2x128xbf16>
    %c3 = arith.constant 3 : index
    %c0_25 = arith.constant 0 : index
    %c0_26 = arith.constant 0 : index
    %77 = vector.load %arg6[%c3, %c0_25, %c0_26] : memref<4x128x32xbf16, #tpu.memory_space<vmem>>, vector<1x128x32xbf16>
    %78 = vector.shape_cast %77 : vector<1x128x32xbf16> to vector<128x32xbf16>
    %cst_27 = arith.constant dense<0.000000e+00> : vector<2x32xf32>
    %79 = tpu.matmul %76, %78, %cst_27 {dimension_numbers = #tpu.dot_dimension_numbers<[1], [0], [0], [1], [0, 0, 1, 1], [], []>} : vector<2x128xbf16>, vector<128x32xbf16>, vector<2x32xf32> -> vector<2x32xf32>
    %80 = arith.addf %73, %79 : vector<2x32xf32>
    %c0_28 = arith.constant 0 : index
    %c0_29 = arith.constant 0 : index
    %81 = vector.load %arg7[%c0_28, %c0_29] : memref<1x32xf32, #tpu.memory_space<vmem>>, vector<1x32xf32>
    %82 = vector.broadcast %81 : vector<1x32xf32> to vector<2x32xf32>
    %83 = arith.addf %80, %82 : vector<2x32xf32>
    %84 = math.tanh %83 : vector<2x32xf32>
    %85 = arith.truncf %84 : vector<2x32xf32> to vector<2x32xbf16>
    %c0_30 = arith.constant 0 : index
    %c0_31 = arith.constant 0 : index
    %86 = vector.load %arg8[%c0_30, %c0_31] : memref<32x32xbf16, #tpu.memory_space<vmem>>, vector<32x32xbf16>
    %cst_32 = arith.constant dense<0.000000e+00> : vector<2x32xf32>
    %87 = tpu.matmul %85, %86, %cst_32 {dimension_numbers = #tpu.dot_dimension_numbers<[1], [0], [0], [1], [0, 0, 1, 1], [], []>} : vector<2x32xbf16>, vector<32x32xbf16>, vector<2x32xf32> -> vector<2x32xf32>
    %c0_33 = arith.constant 0 : index
    %c0_34 = arith.constant 0 : index
    %88 = vector.load %arg9[%c0_33, %c0_34] : memref<1x32xf32, #tpu.memory_space<vmem>>, vector<1x32xf32>
    %89 = vector.broadcast %88 : vector<1x32xf32> to vector<2x32xf32>
    %90 = arith.addf %87, %89 : vector<2x32xf32>
    %91 = math.tanh %90 : vector<2x32xf32>
    %92 = arith.truncf %91 : vector<2x32xf32> to vector<2x32xbf16>
    %c0_35 = arith.constant 0 : index
    %c0_36 = arith.constant 0 : index
    %93 = vector.load %arg10[%c0_35, %c0_36] : memref<32x32xbf16, #tpu.memory_space<vmem>>, vector<32x32xbf16>
    %cst_37 = arith.constant dense<0.000000e+00> : vector<2x32xf32>
    %94 = tpu.matmul %92, %93, %cst_37 {dimension_numbers = #tpu.dot_dimension_numbers<[1], [0], [0], [1], [0, 0, 1, 1], [], []>} : vector<2x32xbf16>, vector<32x32xbf16>, vector<2x32xf32> -> vector<2x32xf32>
    %c0_38 = arith.constant 0 : index
    %c0_39 = arith.constant 0 : index
    %95 = vector.load %arg11[%c0_38, %c0_39] : memref<1x32xf32, #tpu.memory_space<vmem>>, vector<1x32xf32>
    %96 = vector.broadcast %95 : vector<1x32xf32> to vector<2x32xf32>
    %97 = arith.addf %94, %96 : vector<2x32xf32>
    %c0_40 = arith.constant 0 : index
    %c0_41 = arith.constant 0 : index
    %98 = vector.load %arg1[%c0_40, %c0_41] : memref<8x2xf32, #tpu.memory_space<vmem>>, vector<8x2xf32>
    %99 = arith.truncf %98 : vector<8x2xf32> to vector<8x2xbf16>
    %c0_42 = arith.constant 0 : index
    %c0_43 = arith.constant 0 : index
    %100 = vector.load %arg12[%c0_42, %c0_43] : memref<2x256xbf16, #tpu.memory_space<vmem>>, vector<2x256xbf16>
    %cst_44 = arith.constant dense<0.000000e+00> : vector<8x256xf32>
    %101 = tpu.matmul %99, %100, %cst_44 {dimension_numbers = #tpu.dot_dimension_numbers<[1], [0], [0], [1], [0, 0, 1, 1], [], []>} : vector<8x2xbf16>, vector<2x256xbf16>, vector<8x256xf32> -> vector<8x256xf32>
    %c0_45 = arith.constant 0 : index
    %c0_46 = arith.constant 0 : index
    %102 = vector.load %arg13[%c0_45, %c0_46] : memref<1x256xf32, #tpu.memory_space<vmem>>, vector<1x256xf32>
    %103 = vector.broadcast %102 : vector<1x256xf32> to vector<8x256xf32>
    %104 = arith.addf %101, %103 : vector<8x256xf32>
    %105 = math.tanh %104 : vector<8x256xf32>
    %106 = arith.truncf %105 : vector<8x256xf32> to vector<8x256xbf16>
    %c0_47 = arith.constant 0 : index
    %c0_48 = arith.constant 0 : index
    %107 = vector.load %arg14[%c0_47, %c0_48] : memref<256x256xbf16, #tpu.memory_space<vmem>>, vector<256x256xbf16>
    %cst_49 = arith.constant dense<0.000000e+00> : vector<8x256xf32>
    %108 = tpu.matmul %106, %107, %cst_49 {dimension_numbers = #tpu.dot_dimension_numbers<[1], [0], [0], [1], [0, 0, 1, 1], [], []>} : vector<8x256xbf16>, vector<256x256xbf16>, vector<8x256xf32> -> vector<8x256xf32>
    %c0_50 = arith.constant 0 : index
    %c0_51 = arith.constant 0 : index
    %109 = vector.load %arg15[%c0_50, %c0_51] : memref<1x256xf32, #tpu.memory_space<vmem>>, vector<1x256xf32>
    %110 = vector.broadcast %109 : vector<1x256xf32> to vector<8x256xf32>
    %111 = arith.addf %108, %110 : vector<8x256xf32>
    %112 = math.tanh %111 : vector<8x256xf32>
    %113 = arith.truncf %112 : vector<8x256xf32> to vector<8x256xbf16>
    %c0_52 = arith.constant 0 : index
    %c0_53 = arith.constant 0 : index
    %114 = vector.load %arg16[%c0_52, %c0_53] : memref<256x32xbf16, #tpu.memory_space<vmem>>, vector<256x32xbf16>
    %cst_54 = arith.constant dense<0.000000e+00> : vector<8x32xf32>
    %115 = tpu.matmul %113, %114, %cst_54 {dimension_numbers = #tpu.dot_dimension_numbers<[1], [0], [0], [1], [0, 0, 1, 1], [], []>} : vector<8x256xbf16>, vector<256x32xbf16>, vector<8x32xf32> -> vector<8x32xf32>
    %c0_55 = arith.constant 0 : index
    %c0_56 = arith.constant 0 : index
    %116 = vector.load %arg17[%c0_55, %c0_56] : memref<1x32xf32, #tpu.memory_space<vmem>>, vector<1x32xf32>
    %117 = vector.broadcast %116 : vector<1x32xf32> to vector<8x32xf32>
    %118 = arith.addf %115, %117 : vector<8x32xf32>
    %119 = vector.extract_strided_slice %98 {offsets = [0, 0], sizes = [8, 1], strides = [1, 1]} : vector<8x2xf32> to vector<8x1xf32>
    %cst_57 = arith.constant 0.000000e+00 : f32
    %120 = vector.broadcast %cst_57 : f32 to vector<8x1xf32>
    %121 = arith.subf %120, %119 : vector<8x1xf32>
    %cst_58 = arith.constant 6.000000e+00 : f32
    %122 = vector.broadcast %cst_58 : f32 to vector<8x1xf32>
    %123 = arith.divf %121, %122 : vector<8x1xf32>
    %124 = math.exp %123 : vector<8x1xf32>
    %cst_59 = arith.constant 1.000000e+00 : f32
    %125 = vector.broadcast %cst_59 : f32 to vector<8x1xf32>
    %126 = arith.subf %125, %124 : vector<8x1xf32>
    %127 = vector.broadcast %126 : vector<8x1xf32> to vector<8x32xf32>
    %128 = arith.mulf %118, %127 : vector<8x32xf32>
    %129 = vector.extract_strided_slice %97 {offsets = [0, 0], sizes = [2, 16], strides = [1, 1]} : vector<2x32xf32> to vector<2x16xf32>
    %130 = vector.extract_strided_slice %97 {offsets = [0, 16], sizes = [2, 16], strides = [1, 1]} : vector<2x32xf32> to vector<2x16xf32>
    %131 = vector.extract_strided_slice %128 {offsets = [0, 0], sizes = [8, 16], strides = [1, 1]} : vector<8x32xf32> to vector<8x16xf32>
    %132 = vector.extract_strided_slice %128 {offsets = [0, 16], sizes = [8, 16], strides = [1, 1]} : vector<8x32xf32> to vector<8x16xf32>
    %cst_60 = arith.constant dense<0.000000e+00> : vector<2x8xf32>
    %133 = tpu.matmul %129, %131, %cst_60 {dimension_numbers = #tpu.dot_dimension_numbers<[1], [1], [0], [0], [0, 0, 1, 0], [], []>} : vector<2x16xf32>, vector<8x16xf32>, vector<2x8xf32> -> vector<2x8xf32>
    %cst_61 = arith.constant dense<0.000000e+00> : vector<2x8xf32>
    %134 = tpu.matmul %130, %132, %cst_61 {dimension_numbers = #tpu.dot_dimension_numbers<[1], [1], [0], [0], [0, 0, 1, 0], [], []>} : vector<2x16xf32>, vector<8x16xf32>, vector<2x8xf32> -> vector<2x8xf32>
    %135 = tpu.concatenate %133, %134 in 1 : vector<2x8xf32>, vector<2x8xf32> -> vector<2x16xf32>
    %c0_62 = arith.constant 0 : index
    %c0_63 = arith.constant 0 : index
    %136 = vector.load %arg18[%c0_62, %c0_63] : memref<2x16xf32, #tpu.memory_space<vmem>>, vector<2x16xf32>
    tpu.vector_store %arg18[%c0_62, %c0_63], %135 {strides = array<i32>} : memref<2x16xf32, #tpu.memory_space<vmem>>, vector<2x16xf32>,
    return
  }
}

</mosaic_0001>

<bundles_post_ra>
// kernel: conv_deeponet_forward.1
= control target key start
LH: loop header
LB: loop body
LE: loop exit
PB: predicated region body
PF: predicated region fallthrough
CT: control target
= control target key end

     0   :  { %vm87_vm0 = vcmask 1040384   ;;  %vm88_vm1 = vcmask 1041408   ;;  %v1792_v1 = vmov 65535   ;;  %vm80_vm2 = vcmask 23552   ;;  %s1795_s23 = smov 1   ;;  %s1796_s24 = smov 127   ;;  %s2345_s0 = inlined_call_operand.vmem [shape: f32[2,3,128], index: 0, kind: input, shape index: {}]   ;;  %s2346_s2 = inlined_call_operand.vmem [shape: bf16[20,3], index: 2, kind: input, shape index: {}]   ;;  %s2347_s3 = inlined_call_operand.vmem [shape: f32[4,1], index: 3, kind: input, shape index: {}]   ;;  %s2348_s4 = inlined_call_operand.vmem [shape: bf16[20,4], index: 4, kind: input, shape index: {}]   ;;  %s2349_s5 = inlined_call_operand.vmem [shape: f32[4,1], index: 5, kind: input, shape index: {}]   ;;  %s2350_s6 = inlined_call_operand.vmem [shape: bf16[4,128,32], index: 6, kind: input, shape index: {}]   ;;  %s2351_s7 = inlined_call_operand.vmem [shape: f32[1,32], index: 7, kind: input, shape index: {}]   ;;  %s2352_s9 = inlined_call_operand.vmem [shape: f32[1,32], index: 9, kind: input, shape index: {}]   ;;  %s2353_s8 = inlined_call_operand.vmem [shape: bf16[32,32], index: 8, kind: input, shape index: {}]   ;;  %s2354_s11 = inlined_call_operand.vmem [shape: f32[1,32], index: 11, kind: input, shape index: {}]   ;;  %s2355_s10 = inlined_call_operand.vmem [shape: bf16[32,32], index: 10, kind: input, shape index: {}]   ;;  %s2356_s12 = inlined_call_operand.vmem [shape: bf16[2,256], index: 12, kind: input, shape index: {}]   ;;  %s2357_s1 = inlined_call_operand.vmem [shape: f32[8,2], index: 1, kind: input, shape index: {}]   ;;  %s2358_s14 = inlined_call_operand.vmem [shape: bf16[256,256], index: 14, kind: input, shape index: {}]   ;;  %s2359_s13 = inlined_call_operand.vmem [shape: f32[1,256], index: 13, kind: input, shape index: {}]   ;;  %s2360_s17 = inlined_call_operand.vmem [shape: f32[1,32], index: 17, kind: input, shape index: {}]   ;;  %s2361_s16 = inlined_call_operand.vmem [shape: bf16[256,32], index: 16, kind: input, shape index: {}]   ;;  %s2362_s15 = inlined_call_operand.vmem [shape: f32[1,256], index: 15, kind: input, shape index: {}]   ;;  %s2363_s18 = inlined_call_operand.vmem [shape: f32[2,16], index: 18, kind: output, shape index: {}]  }
   0x1   :  { %2366 = sst [smem:[#allocation2_spill]] %s2345_s0  ;;  %v89_v2 = vsel %vm87_vm0, 4294967295, %v1792_v1  ;;  %v1793_v13 = vmov 0   ;;  %s1797_s25 = smov 126   ;;  %v60_v37 = vlaneseq  ;;  %v1798_v48 = vmov 0.0   ;;  %v1667_v57 = vld [vmem:[%s2348_s4] sm:$0xff] }
   0x2   :  { %2367 = sst [smem:[#allocation3_spill]] %s2346_s2  ;;  %v90_v5 = vsel %vm88_vm1, %v89_v2, 0  ;;  %1762 = vset.pattern.permute.xlu2 %v1793_v13  ;;  %1763 = vset.pattern.permute.xlu0 %v1793_v13  ;;  %vm194_vm4 = vcmask 31744   ;;  %v183_v59 = vld [vmem:[%s2348_s4 + $0x8] sm:$0x3]  ;;  %v1691_v13 = vld [vmem:[%s2350_s6 + $0xb8] sm:$0xff] }
   0x3   :  { %2368 = sst [smem:[#allocation4_spill]] %s2347_s3  ;;  %s1794_s3 = smov 2   ;;  %v61_v44 = vand.u32 127, %v60_v37  ;;  %v191_v60 = vunpack.c.l.b16 %v183_v59  ;;  %v1685_v37 = vld [vmem:[%s2350_s6 + $0x88] sm:$0xff]  ;;  %vm329_vm5 = vcmask 1041409   ;;  %vm654_vm6 = vcmask 261120  }
   0x4   :  { %s2369_s29 = sld [smem:[#allocation2_spill]]  ;;  %vm722_vm7 = vcmask 15360   ;;  %s1799_s19 = smov 112   ;;  %vm1190_vm9 = vcmask 130048   ;;  %vm1249_vm10 = vcmask 64512   ;;  %vm1251_vm11 = vcmask 123904  }
   0x5   :  { %s2370_s20 = sld [smem:[#allocation3_spill]]  ;;  %vm62_vm3 = vcmp.lt.s32.totalorder %v61_v44, 101  ;;  %v193_v61 = vpack.c.b16 %v191_v60, %v191_v60  ;;  %v1692_v44 = vld [vmem:[%s2350_s6 + $0xc0] sm:$0xff]  ;;  %s1801_s22 = smov 8  }
   0x6   :  { %s2371_s28 = sld [smem:[#allocation4_spill]]  ;;  %v1257_v49 = vsel %vm62_vm3, 1.0, %v1798_v48 }
   0xa   :  { %v65_v0 = vld [vmem:[%s2369_s29] sm:$0x7]  ;;  %v66_v3 = vld [vmem:[%s2369_s29 + $0x4] sm:$0x7] }
   0xb   :  { %v70_v4 = vpack.c.bf16 %v65_v0, %v65_v0  ;;  %v71_v6 = vpack.c.bf16 %v66_v3, %v66_v3  ;;  %v1666_v9 = vld [vmem:[%s2370_s20] sm:$0xff]  ;;  %v69_v10 = vld [vmem:[%s2370_s20 + $0x8] sm:$0x3] }
   0xc   :  { %v77_v11 = vunpack.c.l.b16 %v69_v10  ;;  %v169_v26 = vld [vmem:[%s2371_s28] sm:$0xf] }
   0xd   :  { %v92_v7 = vand.u32 %v90_v5, %v70_v4  ;;  %v113_v8 = vand.u32 %v90_v5, %v71_v6 }
   0xe   :  { %v79_v12 = vpack.c.b16 %v77_v11, %v77_v11  ;;  %v1683_v11 = vld [vmem:[%s2350_s6 + $0x78] sm:$0xff] }
   0xf   :  { %101 = vmatpush.bf16.msra.mxu0 %v92_v7  ;;  %122 = vmatpush.bf16.msra.mxu1 %v113_v8  ;;  %v279_v8 = vld [vmem:[%s2349_s5] sm:$0xf] }
  0x12   :  { %1262 = vmatmul.msk.bf16.vlgmr.msra.gmra.mxu0 %vm80_vm2, %v1666_v9  ;;  %1264 = vmatmul.msk.bf16.vlgmr.msra.gmra.mxu1 %vm80_vm2, %v1666_v9 }
  0x13   :  { %381 = vmatpush.bf16.msrb.mxu0 %v1683_v11 }
  0x22   :  { %1263 = vmatmul.msk.bf16.gmra.mxu0 %vm80_vm2, %v79_v12  ;;  %1265 = vmatmul.msk.bf16.gmra.mxu1 %vm80_vm2, %v79_v12  ;;  %v1675_v12 = vld [vmem:[%s2350_s6 + $0x38] sm:$0xff] }
  0x23   :  { %446 = vmatpush.bf16.msrb.mxu1 %v1675_v12 }
  0x8f   :  { %v103_v14 = vpop.f32.mrf.mxu0  ;;  %v124_v15 = vpop.f32.mrf.mxu1 }
  0x90   :  { %133 = vrot.lane.b32.xlu0 %v103_v14, %s1794_s3  ;;  %v139_v16 = vrot.slane %v103_v14, 4  ;;  %v140_v19 = vrot.slane %v124_v15, 4  ;;  %v1699_v14 = vld [vmem:[%s2350_s6 + $0xf8] sm:$0xff] }
  0x92   :  { %143 = vrot.lane.b32.xlu1 %v139_v16, %s1795_s23  ;;  %v1674_v16 = vld [vmem:[%s2350_s6 + $0x30] sm:$0xff] }
  0x93   :  { %447 = vmatpush.bf16.msrb.mxu1 %v1674_v16 }
  0x97   :  { %v105_v17 = vpop.f32.mrf.mxu0  ;;  %v126_v18 = vpop.f32.mrf.mxu1 }
  0x98   :  { %135 = vrot.lane.b32.xlu0 %v124_v15, %s1794_s3  ;;  %v153_v20 = vrot.slane %v105_v17, 4  ;;  %v154_v23 = vrot.slane %v126_v18, 4  ;;  %v1682_v15 = vld [vmem:[%s2350_s6 + $0x70] sm:$0xff] }
  0x99   :  { %382 = vmatpush.bf16.msrb.mxu0 %v1682_v15 }
  0x9a   :  { %145 = vrot.lane.b32.xlu1 %v140_v19, %s1795_s23  ;;  %157 = vrot.lane.b32.xlu2 %v153_v20, %s1796_s24  ;;  %v1681_v19 = vld [vmem:[%s2350_s6 + $0x68] sm:$0xff] }
  0x9b   :  { %v1673_v20 = vld [vmem:[%s2350_s6 + $0x28] sm:$0xff] }
  0x9c   :  { %448 = vmatpush.bf16.msrb.mxu1 %v1673_v20 }
  0x9d   :  { %383 = vmatpush.bf16.msrb.mxu0 %v1681_v19  ;;  %v1700_v19 = vld [vmem:[%s2353_s8] sm:$0xff] }
  0x9f   :  { %v108_v21 = vpop.f32.mrf.mxu0  ;;  %v129_v22 = vpop.f32.mrf.mxu1 }
  0xa0   :  { %163 = vrot.lane.b32.xlu0 %v108_v21, %s1797_s25  ;;  %v1689_v21 = vld [vmem:[%s2350_s6 + $0xa8] sm:$0xff] }
  0xa2   :  { %165 = vrot.lane.b32.xlu1 %v129_v22, %s1797_s25  ;;  %159 = vrot.lane.b32.xlu2 %v154_v23, %s1796_s24  ;;  %v1697_v22 = vld [vmem:[%s2350_s6 + $0xe8] sm:$0xff]  ;;  %v1680_v23 = vld [vmem:[%s2350_s6 + $0x60] sm:$0xff] }
  0xa3   :  { %384 = vmatpush.bf16.msrb.mxu0 %v1680_v23 }
  0xa7   :  { %v110_v24 = vpop.f32.mrf.mxu0  ;;  %v131_v25 = vpop.f32.mrf.mxu1 }
  0xa8   :  { %v1672_v24 = vld [vmem:[%s2350_s6 + $0x20] sm:$0xff] }
  0xa9   :  { %v1688_v25 = vld [vmem:[%s2350_s6 + $0xa0] sm:$0xff]  ;;  %449 = vmatpush.bf16.msrb.mxu1 %v1672_v24 }
  0xaa   :  { %172 = vperm.xlu2 %1762, %v169_v26   ;;  %v1696_v26 = vld [vmem:[%s2350_s6 + $0xe0] sm:$0xff] }
  0xf4   :  { %v158_v27 = vpop.permute.xlu2 %157 }
  0xfc   :  { %v160_v31 = vpop.permute.xlu2 %159 }
 0x102   :  { %v134_v28 = vpop.permute.xlu0 %133 }
 0x104   :  { %v144_v29 = vpop.permute.xlu1 %143  ;;  %v173_v40 = vpop.permute.xlu2 %172 }
 0x105   :  { %v147_v30 = vadd.f32 %v144_v29, %v134_v28  ;;  %v1671_v28 = vld [vmem:[%s2350_s6 + $0x18] sm:$0xff] }
 0x106   :  { %v1687_v29 = vld [vmem:[%s2350_s6 + $0x98] sm:$0xff]  ;;  %450 = vmatpush.bf16.msrb.mxu1 %v1671_v28 }
 0x107   :  { %v149_v34 = vadd.f32 %v147_v30, %v105_v17  ;;  %v1690_v17 = vld [vmem:[%s2350_s6 + $0xb0] sm:$0xff]  ;;  %v1695_v30 = vld [vmem:[%s2350_s6 + $0xd8] sm:$0xff] }
 0x109   :  { %v161_v38 = vadd.f32 %v158_v27, %v149_v34  ;;  %v1679_v27 = vld [vmem:[%s2350_s6 + $0x58] sm:$0xff]  ;;  %v1694_v34 = vld [vmem:[%s2350_s6 + $0xd0] sm:$0xff] }
 0x10a   :  { %v136_v32 = vpop.permute.xlu0 %135  ;;  %385 = vmatpush.bf16.msrb.mxu0 %v1679_v27  ;;  %v1764_v27 = vld [vmem:[%s2351_s7] ss:$0 sm:$0xff] }
 0x10c   :  { %v146_v33 = vpop.permute.xlu1 %145 }
 0x10d   :  { %v148_v35 = vadd.f32 %v146_v33, %v136_v32  ;;  %v1670_v32 = vld [vmem:[%s2350_s6 + $0x10] sm:$0xff] }
 0x10e   :  { %v1686_v33 = vld [vmem:[%s2350_s6 + $0x90] sm:$0xff]  ;;  %451 = vmatpush.bf16.msrb.mxu1 %v1670_v32 }
 0x10f   :  { %v150_v36 = vadd.f32 %v148_v35, %v126_v18  ;;  %v1698_v18 = vld [vmem:[%s2350_s6 + $0xf0] sm:$0xff]  ;;  %v1677_v35 = vld [vmem:[%s2350_s6 + $0x48] sm:$0xff] }
 0x111   :  { %v162_v42 = vadd.f32 %v160_v31, %v150_v36  ;;  %v1678_v31 = vld [vmem:[%s2350_s6 + $0x50] sm:$0xff]  ;;  %v1669_v36 = vld [vmem:[%s2350_s6 + $0x8] sm:$0xff] }
 0x112   :  { %v164_v39 = vpop.permute.xlu0 %163  ;;  %386 = vmatpush.bf16.msrb.mxu0 %v1678_v31  ;;  %452 = vmatpush.bf16.msrb.mxu1 %v1669_v36  ;;  %v711_v36 = vld [vmem:[%s2356_s12] sm:$0x3] }
 0x113   :  { %v167_v41 = vadd.f32 %v164_v39, %v161_v38  ;;  %v1693_v38 = vld [vmem:[%s2350_s6 + $0xc8] sm:$0xff]  ;;  %719 = vst [vmem:[#allocation1] ss:$9 sm:$0xff] %v711_v36 }
 0x114   :  { %v166_v43 = vpop.permute.xlu1 %165 }
 0x115   :  { %v168_v45 = vadd.f32 %v166_v43, %v162_v42  ;;  %v175_v46 = vadd.f32 %v173_v40, %v167_v41  ;;  %v1676_v41 = vld [vmem:[%s2350_s6 + $0x40] sm:$0xff] }
 0x116   :  { %387 = vmatpush.bf16.msrb.mxu0 %v1677_v35  ;;  %v1668_v42 = vld [vmem:[%s2350_s6] sm:$0xff]  ;;  %v1703_v35 = vld [vmem:[%s2355_s10 + $0x8] sm:$0xff] }
 0x117   :  { %v176_v47 = vadd.f32 %v173_v40, %v168_v45  ;;  %1768 = vtanh.f32 %v175_v46  ;;  %v1684_v43 = vld [vmem:[%s2350_s6 + $0x80] sm:$0xff]  ;;  %453 = vmatpush.bf16.msrb.mxu1 %v1668_v42 }
 0x119   :  { %1770 = vtanh.f32 %v176_v47 }
 0x11a   :  { %388 = vmatpush.bf16.msrb.mxu0 %v1676_v41 }
 0x11d   :  { %v1769_v50 = vpop.eup %1768 }
 0x11e   :  { %v179_v51 = vmul.f32 %v1769_v50, %v1257_v49 }
 0x11f   :  { %v1771_v52 = vpop.eup %1770 }
 0x120   :  { %v184_v53 = vpack.c.bf16 %v179_v51, %v179_v51  ;;  %v180_v54 = vmul.f32 %v1771_v52, %v1257_v49 }
 0x122   :  { %v202_v55 = vsel %vm88_vm1, %v184_v53, 0  ;;  %v185_v56 = vpack.c.bf16 %v180_v54, %v180_v54 }
 0x123   :  { %211 = vmatpush.bf16.msra.mxu2 %v202_v55 }
 0x124   :  { %v223_v58 = vsel %vm88_vm1, %v185_v56, 0 }
 0x125   :  { %232 = vmatpush.bf16.msra.mxu3 %v223_v58 }
 0x126   :  { %1270 = vmatmul.msk.bf16.vlgmr.msra.gmra.mxu2 %vm194_vm4, %v1667_v57 }
 0x127   :  { %529 = vmatpush.bf16.msrb.mxu2 %v1691_v13 }
 0x128   :  { %1272 = vmatmul.msk.bf16.vlgmr.msra.gmra.mxu3 %vm194_vm4, %v1667_v57 }
 0x129   :  { %613 = vmatpush.bf16.msrb.mxu3 %v1699_v14 }
 0x12b   :  { %530 = vmatpush.bf16.msrb.mxu2 %v1690_v17 }
 0x12d   :  { %614 = vmatpush.bf16.msrb.mxu3 %v1698_v18  ;;  %v1701_v18 = vld [vmem:[%s2353_s8 + $0x8] sm:$0xff] }
 0x12f   :  { %531 = vmatpush.bf16.msrb.mxu2 %v1689_v21 }
 0x131   :  { %615 = vmatpush.bf16.msrb.mxu3 %v1697_v22 }
 0x133   :  { %532 = vmatpush.bf16.msrb.mxu2 %v1688_v25 }
 0x135   :  { %616 = vmatpush.bf16.msrb.mxu3 %v1696_v26 }
 0x136   :  { %1271 = vmatmul.msk.bf16.gmra.mxu2 %vm194_vm4, %v193_v61 }
 0x137   :  { %533 = vmatpush.bf16.msrb.mxu2 %v1687_v29 }
 0x138   :  { %1273 = vmatmul.msk.bf16.gmra.mxu3 %vm194_vm4, %v193_v61 }
 0x139   :  { %617 = vmatpush.bf16.msrb.mxu3 %v1695_v30 }
 0x13b   :  { %534 = vmatpush.bf16.msrb.mxu2 %v1686_v33 }
 0x13d   :  { %618 = vmatpush.bf16.msrb.mxu3 %v1694_v34 }
 0x13f   :  { %535 = vmatpush.bf16.msrb.mxu2 %v1685_v37  ;;  %v1702_v37 = vld [vmem:[%s2355_s10] sm:$0xff] }
 0x141   :  { %619 = vmatpush.bf16.msrb.mxu3 %v1693_v38  ;;  %v2067_v38 = vld [vmem:[%s2357_s1] sm:$0xff] }
 0x142   :  { %v710_v42 = vpack.c.bf16 %v2067_v38, %v2067_v38 }
 0x143   :  { %536 = vmatpush.bf16.msrb.mxu2 %v1684_v43 }
 0x145   :  { %620 = vmatpush.bf16.msrb.mxu3 %v1692_v44  ;;  %v1765_v44 = vld [vmem:[%s2352_s9] ss:$0 sm:$0xff] }
 0x147   :  { %664 = vmatpush.bf16.msra.mxu2 %v1701_v18  ;;  %v1732_v18 = vld [vmem:[%s2358_s14 + $0xe4] sm:$0xf] }
 0x149   :  { %702 = vmatpush.bf16.msra.mxu3 %v1703_v35 }
 0x14b   :  { %665 = vmatpush.bf16.msra.mxu2 %v1700_v19 }
 0x14d   :  { %703 = vmatpush.bf16.msra.mxu3 %v1702_v37  ;;  %v1709_v37 = vld [vmem:[%s2358_s14 + $0x24] sm:$0xf0] }
 0x1a9   :  { %v213_v62 = vpop.f32.mrf.mxu2 }
 0x1aa   :  { %v249_v63 = vrot.slane %v213_v62, 4  ;;  %243 = vrot.lane.b32.xlu0 %v213_v62, %s1794_s3 }
 0x1ab   :  { %v234_v0 = vpop.f32.mrf.mxu3 }
 0x1ac   :  { %245 = vrot.lane.b32.xlu1 %v234_v0, %s1794_s3  ;;  %253 = vrot.lane.b32.xlu2 %v249_v63, %s1795_s23  ;;  %v250_v1 = vrot.slane %v234_v0, 4 }
 0x1b1   :  { %v1933_v2 = vpop.f32.mrf.mxu2 }
 0x1b2   :  { %v263_v3 = vrot.slane %v1933_v2, 4  ;;  %255 = vrot.lane.b32.xlu0 %v250_v1, %s1795_s23 }
 0x1b3   :  { %v1937_v4 = vpop.f32.mrf.mxu3 }
 0x1b4   :  { %v264_v5 = vrot.slane %v1937_v4, 4  ;;  %267 = vrot.lane.b32.xlu1 %v263_v3, %s1796_s24 }
 0x1b6   :  { %269 = vrot.lane.b32.xlu2 %v264_v5, %s1796_s24 }
 0x1b9   :  { %v218_v6 = vpop.f32.mrf.mxu2 }
 0x1ba   :  { %273 = vrot.lane.b32.xlu0 %v218_v6, %s1797_s25 }
 0x1bb   :  { %v239_v7 = vpop.f32.mrf.mxu3 }
 0x1bc   :  { %275 = vrot.lane.b32.xlu1 %v239_v7, %s1797_s25 }
 0x1be   :  { %282 = vperm.xlu2 %1762, %v279_v8  }
 0x1c1   :  { %v220_v9 = vpop.f32.mrf.mxu2 }
 0x1c3   :  { %v241_v10 = vpop.f32.mrf.mxu3 }
 0x206   :  { %v254_v39 = vpop.permute.xlu2 %253 }
 0x210   :  { %v270_v46 = vpop.permute.xlu2 %269 }
 0x218   :  { %v283_v57 = vpop.permute.xlu2 %282 }
 0x21c   :  { %v244_v40 = vpop.permute.xlu0 %243 }
 0x21d   :  { %v257_v48 = vadd.f32 %v254_v39, %v244_v40  ;;  %v720_v39 = vld [vmem:[#allocation1] sm:$0xff]  ;;  %v721_v40 = vld [vmem:[#allocation1 + $0x9] sm:$0xff] }
 0x21e   :  { %v246_v45 = vpop.permute.xlu1 %245  ;;  %v726_v41 = vsel %vm87_vm0, %v720_v39, 0  ;;  %v728_v43 = vsel %vm87_vm0, %v721_v40, 0  ;;  %v1708_v39 = vld [vmem:[%s2358_s14 + $0x24] sm:$0xf] }
 0x21f   :  { %v259_v52 = vadd.f32 %v257_v48, %v1933_v2 }
 0x224   :  { %v256_v47 = vpop.permute.xlu0 %255 }
 0x225   :  { %v258_v49 = vadd.f32 %v256_v47, %v246_v45  ;;  %v1528_v45 = vld [vmem:[%s2358_s14 + $0x70] sm:$0xf]  ;;  %v1718_v47 = vld [vmem:[%s2358_s14 + $0x74] sm:$0xf] }
 0x226   :  { %v268_v50 = vpop.permute.xlu1 %267 }
 0x227   :  { %v260_v51 = vadd.f32 %v258_v49, %v1937_v4  ;;  %v271_v53 = vadd.f32 %v268_v50, %v259_v52  ;;  %v1530_v49 = vld [vmem:[%s2358_s14 + $0x78] sm:$0xf0]  ;;  %v1520_v50 = vld [vmem:[%s2358_s14 + $0x60] sm:$0xf] }
 0x228   :  { %v1533_v52 = vor.u32 %v1718_v47, %v1530_v49  ;;  %v1570_v49 = vld [vmem:[%s2358_s14 + $0xc8] sm:$0xf0] }
 0x229   :  { %v272_v56 = vadd.f32 %v270_v46, %v260_v51  ;;  %v1719_v46 = vld [vmem:[%s2358_s14 + $0x74] sm:$0xf0]  ;;  %v1717_v51 = vld [vmem:[%s2358_s14 + $0x64] sm:$0xf0] }
 0x22a   :  { %v1529_v48 = vor.u32 %v1719_v46, %v1528_v45  ;;  %v1729_v45 = vld [vmem:[%s2358_s14 + $0xc4] sm:$0xf0]  ;;  %v1728_v46 = vld [vmem:[%s2358_s14 + $0xc4] sm:$0xf] }
 0x22c   :  { %v274_v54 = vpop.permute.xlu0 %273  ;;  %958 = vmatpush.bf16.msra.mxu0 %v1529_v48 }
 0x22d   :  { %v277_v55 = vadd.f32 %v274_v54, %v271_v53  ;;  %v1716_v53 = vld [vmem:[%s2358_s14 + $0x64] sm:$0xf]  ;;  %v1522_v54 = vld [vmem:[%s2358_s14 + $0x68] sm:$0xf0] }
 0x22e   :  { %v276_v58 = vpop.permute.xlu1 %275 }
 0x22f   :  { %v285_v59 = vadd.f32 %v283_v57, %v277_v55  ;;  %v278_v60 = vadd.f32 %v276_v58, %v272_v56  ;;  %v1521_v55 = vor.u32 %v1717_v51, %v1520_v50  ;;  %v1512_v56 = vld [vmem:[%s2358_s14 + $0x50] sm:$0xf]  ;;  %v1525_v58 = vor.u32 %v1716_v53, %v1522_v54  ;;  %v1707_v51 = vld [vmem:[%s2358_s14 + $0x14] sm:$0xf0]  ;;  %v1706_v54 = vld [vmem:[%s2358_s14 + $0x14] sm:$0xf] }
 0x230   :  { %v1480_v50 = vld [vmem:[%s2358_s14 + $0x10] sm:$0xf] }
 0x231   :  { %1772 = vtanh.f32 %v285_v59  ;;  %v286_v61 = vadd.f32 %v283_v57, %v278_v60  ;;  %v1715_v59 = vld [vmem:[%s2358_s14 + $0x54] sm:$0xf0]  ;;  %v1592_v60 = vld [vmem:[%s2358_s14 + $0xf0] sm:$0xf]  ;;  %959 = vmatpush.bf16.msra.mxu0 %v1521_v55  ;;  %v1481_v53 = vor.u32 %v1707_v51, %v1480_v50  ;;  %v1482_v55 = vld [vmem:[%s2358_s14 + $0x18] sm:$0xf0] }
 0x232   :  { %v1747_v50 = vld [vmem:[%s2361_s16 + $0x58] sm:$0xff]  ;;  %v1800_v51 = vmov 6.0  }
 0x233   :  { %1774 = vtanh.f32 %v286_v61  ;;  %v1735_v61 = vld [vmem:[%s2358_s14 + $0xf4] sm:$0xf0] }
 0x237   :  { %v1773_v62 = vpop.eup %1772 }
 0x238   :  { %v289_v63 = vpack.c.bf16 %v1773_v62, %v1773_v62 }
 0x239   :  { %v1775_v0 = vpop.eup %1774 }
 0x23a   :  { %v326_v1 = vunpack.c.l.b16 %v289_v63  ;;  %v290_v3 = vpack.c.bf16 %v1775_v0, %v1775_v0  ;;  %v1714_v63 = vld [vmem:[%s2358_s14 + $0x54] sm:$0xf]  ;;  %v1514_v0 = vld [vmem:[%s2358_s14 + $0x58] sm:$0xf0] }
 0x23c   :  { %v327_v4 = vunpack.c.l.b16 %v290_v3  ;;  %v328_v5 = vrot.slane %v326_v1, 1  ;;  %v476_v2 = vrot.slane %v326_v1, 2  ;;  %v560_v6 = vrot.slane %v326_v1, 3 }
 0x23d   :  { %v1513_v3 = vor.u32 %v1715_v59, %v1512_v56  ;;  %v1560_v56 = vld [vmem:[%s2358_s14 + $0xb0] sm:$0xf]  ;;  %v1726_v59 = vld [vmem:[%s2358_s14 + $0xb4] sm:$0xf] }
 0x23e   :  { %v330_v7 = vsel %vm329_vm5, %v327_v4, %v328_v5  ;;  %v394_v8 = vrot.slane %v327_v4, 7  ;;  %v477_v9 = vrot.slane %v327_v4, 1  ;;  %v561_v10 = vrot.slane %v327_v4, 2  ;;  %v1504_v5 = vld [vmem:[%s2358_s14 + $0x40] sm:$0xf] }
 0x23f   :  { %v331_v11 = vpack.c.b16 %v330_v7, %v330_v7  ;;  %v1517_v4 = vor.u32 %v1714_v63, %v1514_v0  ;;  %v1506_v7 = vld [vmem:[%s2358_s14 + $0x48] sm:$0xf0]  ;;  %960 = vmatpush.bf16.msra.mxu0 %v1513_v3  ;;  %v1472_v63 = vld [vmem:[%s2358_s14] sm:$0xf]  ;;  %v1705_v0 = vld [vmem:[%s2358_s14 + $0x4] sm:$0xf0] }
 0x240   :  { %v395_v12 = vsel %vm329_vm5, %v394_v8, %v326_v1  ;;  %v478_v13 = vsel %vm329_vm5, %v477_v9, %v476_v2  ;;  %v562_v14 = vsel %vm329_vm5, %v561_v10, %v560_v6  ;;  %v1593_v1 = vor.u32 %v1735_v61, %v1592_v60  ;;  %v1713_v2 = vld [vmem:[%s2358_s14 + $0x44] sm:$0xf0]  ;;  %v1712_v6 = vld [vmem:[%s2358_s14 + $0x44] sm:$0xf]  ;;  %v1734_v8 = vld [vmem:[%s2358_s14 + $0xf4] sm:$0xf] }
 0x241   :  { %389 = vmatmul.bf16.vlgmr.msrb.gmra.mxu0 %v331_v11  ;;  %v396_v15 = vpack.c.b16 %v395_v12, %v395_v12  ;;  %v479_v16 = vpack.c.b16 %v478_v13, %v478_v13  ;;  %v563_v17 = vpack.c.b16 %v562_v14, %v562_v14  ;;  %v1594_v9 = vld [vmem:[%s2358_s14 + $0xf8] sm:$0xf0]  ;;  %v1505_v10 = vor.u32 %v1713_v2, %v1504_v5 }
 0x242   :  { %971 = vmatpush.bf16.msra.mxu1 %v1593_v1  ;;  %v1509_v12 = vor.u32 %v1712_v6, %v1506_v7  ;;  %v1597_v14 = vor.u32 %v1734_v8, %v1594_v9  ;;  %v1562_v60 = vld [vmem:[%s2358_s14 + $0xb8] sm:$0xf0]  ;;  %v1704_v1 = vld [vmem:[%s2358_s14 + $0x4] sm:$0xf]  ;;  %v1473_v3 = vor.u32 %v1705_v0, %v1472_v63  ;;  %v1552_v6 = vld [vmem:[%s2358_s14 + $0xa0] sm:$0xf] }
 0x243   :  { %454 = vmatmul.bf16.vlgmr.msrb.gmra.mxu1 %v396_v15  ;;  %537 = vmatmul.bf16.vlgmr.msrb.gmra.mxu2 %v479_v16  ;;  %v1584_v16 = vld [vmem:[%s2358_s14 + $0xe0] sm:$0xf]  ;;  %v1725_v7 = vld [vmem:[%s2358_s14 + $0xa4] sm:$0xf0]  ;;  %v1724_v8 = vld [vmem:[%s2358_s14 + $0xa4] sm:$0xf] }
 0x244   :  { %621 = vmatmul.bf16.vlgmr.msrb.gmra.mxu3 %v563_v17  ;;  %737 = vmatpush.bf16.msrb.mxu2 %v726_v41  ;;  %v1733_v17 = vld [vmem:[%s2358_s14 + $0xe4] sm:$0xf0]  ;;  %v1490_v41 = vld [vmem:[%s2358_s14 + $0x28] sm:$0xf0]  ;;  %v1172_v63 = vsub.f32 0.0, %v2067_v38 }
 0x245   :  { %750 = vmatpush.bf16.msrb.mxu3 %v728_v43  ;;  %961 = vmatpush.bf16.msra.mxu0 %v1505_v10  ;;  %v1585_v19 = vor.u32 %v1733_v17, %v1584_v16  ;;  %v1493_v43 = vor.u32 %v1708_v39, %v1490_v41  ;;  %v1553_v10 = vor.u32 %v1725_v7, %v1552_v6  ;;  %v1722_v16 = vld [vmem:[%s2358_s14 + $0x94] sm:$0xf]  ;;  %v1751_v39 = vld [vmem:[%s2361_s16 + $0x78] sm:$0xff] }
 0x246   :  { %v1750_v41 = vld [vmem:[%s2361_s16 + $0x70] sm:$0xff] }
 0x247   :  { %972 = vmatpush.bf16.msra.mxu1 %v1585_v19 }
 0x2be   :  { %v390_v20 = vpop.f32.mrf.mxu0 }
 0x2c0   :  { %v455_v21 = vpop.f32.mrf.mxu1 }
 0x2c1   :  { %v456_v22 = vadd.f32 %v455_v21, %v390_v20  ;;  %v1586_v20 = vld [vmem:[%s2358_s14 + $0xe8] sm:$0xf0] }
 0x2c2   :  { %v1589_v21 = vor.u32 %v1732_v18, %v1586_v20  ;;  %v1546_v18 = vld [vmem:[%s2358_s14 + $0x98] sm:$0xf0]  ;;  %v1536_v20 = vld [vmem:[%s2358_s14 + $0x80] sm:$0xf] }
 0x2c3   :  { %v1549_v19 = vor.u32 %v1722_v16, %v1546_v18 }
 0x2c6   :  { %v392_v23 = vpop.f32.mrf.mxu0  ;;  %v538_v24 = vpop.f32.mrf.mxu2 }
 0x2c7   :  { %v542_v25 = vadd.f32 %v538_v24, %v456_v22  ;;  %v622_v26 = vpop.f32.mrf.mxu3  ;;  %v1496_v22 = vld [vmem:[%s2358_s14 + $0x30] sm:$0xf]  ;;  %v1711_v23 = vld [vmem:[%s2358_s14 + $0x34] sm:$0xf0]  ;;  %v1710_v24 = vld [vmem:[%s2358_s14 + $0x34] sm:$0xf] }
 0x2c8   :  { %v457_v28 = vpop.f32.mrf.mxu1 }
 0x2c9   :  { %v626_v29 = vadd.f32 %v622_v26, %v542_v25  ;;  %v1497_v25 = vor.u32 %v1711_v23, %v1496_v22  ;;  %v1498_v26 = vld [vmem:[%s2358_s14 + $0x38] sm:$0xf0]  ;;  %v1576_v28 = vld [vmem:[%s2358_s14 + $0xd0] sm:$0xf]  ;;  %v1720_v22 = vld [vmem:[%s2358_s14 + $0x84] sm:$0xf] }
 0x2cb   :  { %v631_v30 = vadd.f32 %v1764_v27, %v626_v29  ;;  %v1501_v27 = vor.u32 %v1710_v24, %v1498_v26  ;;  %v1731_v29 = vld [vmem:[%s2358_s14 + $0xd4] sm:$0xf0]  ;;  %962 = vmatpush.bf16.msra.mxu0 %v1497_v25  ;;  %v1538_v24 = vld [vmem:[%s2358_s14 + $0x88] sm:$0xf0]  ;;  %v1766_v26 = vld [vmem:[%s2354_s11] ss:$0 sm:$0xff] }
 0x2cc   :  { %v1541_v25 = vor.u32 %v1720_v22, %v1538_v24 }
 0x2cd   :  { %1776 = vtanh.f32 %v631_v30  ;;  %v1730_v30 = vld [vmem:[%s2358_s14 + $0xd4] sm:$0xf] }
 0x2ce   :  { %v540_v31 = vpop.f32.mrf.mxu2 }
 0x2cf   :  { %v624_v32 = vpop.f32.mrf.mxu3  ;;  %v1577_v31 = vor.u32 %v1731_v29, %v1576_v28 }
 0x2d0   :  { %v1578_v32 = vld [vmem:[%s2358_s14 + $0xd8] sm:$0xf0] }
 0x2d1   :  { %v1581_v35 = vor.u32 %v1730_v30, %v1578_v32  ;;  %973 = vmatpush.bf16.msra.mxu1 %v1577_v31 }
 0x2d3   :  { %v1777_v33 = vpop.eup %1776 }
 0x2d4   :  { %v633_v34 = vpack.c.bf16 %v1777_v33, %v1777_v33  ;;  %v2178_v33 = vld [vmem:[%s2359_s13] sm:$0x3] }
 0x2d5   :  { %v714_v36 = vperm.slane %v2178_v33, 0  ;;  %v715_v30 = vperm.slane %v2178_v33, 1  ;;  %v1742_v33 = vld [vmem:[%s2361_s16 + $0x30] sm:$0xff] }
 0x2d6   :  { %1458 = vmatmul.msk.bf16.vlgmr.msra.gmra.mxu2 %vm654_vm6, %v633_v34  ;;  %v1488_v34 = vld [vmem:[%s2358_s14 + $0x20] sm:$0xf] }
 0x2d7   :  { %984 = vmatpush.bf16.msra.mxu2 %v1533_v52  ;;  %v1489_v40 = vor.u32 %v1709_v37, %v1488_v34  ;;  %v1573_v52 = vor.u32 %v1728_v46, %v1570_v49  ;;  %v1743_v37 = vld [vmem:[%s2361_s16 + $0x38] sm:$0xff]  ;;  %v1738_v49 = vld [vmem:[%s2361_s16 + $0x10] sm:$0xff] }
 0x2d9   :  { %963 = vmatpush.bf16.msra.mxu0 %v1489_v40  ;;  %v1741_v40 = vld [vmem:[%s2361_s16 + $0x28] sm:$0xff] }
 0x2db   :  { %985 = vmatpush.bf16.msra.mxu2 %v1525_v58  ;;  %v1727_v58 = vld [vmem:[%s2358_s14 + $0xb4] sm:$0xf0] }
 0x2dc   :  { %v1561_v61 = vor.u32 %v1727_v58, %v1560_v56 }
 0x2dd   :  { %964 = vmatpush.bf16.msra.mxu0 %v1481_v53 }
 0x2df   :  { %986 = vmatpush.bf16.msra.mxu2 %v1517_v4  ;;  %v1474_v4 = vld [vmem:[%s2358_s14 + $0x8] sm:$0xf0] }
 0x2e0   :  { %v1477_v5 = vor.u32 %v1704_v1, %v1474_v4  ;;  %v792_v4 = vld [vmem:[%s2362_s15] sm:$0x3] }
 0x2e1   :  { %965 = vmatpush.bf16.msra.mxu0 %v1473_v3 }
 0x2e3   :  { %987 = vmatpush.bf16.msra.mxu2 %v1509_v12 }
 0x2e5   :  { %1146 = vmatpush.bf16.msrb.mxu0 %v1743_v37 }
 0x2e6   :  { %1468 = vmatmul.msk.bf16.vlgmr.msrb.gmra.mxu2 %vm722_vm7, %v710_v42 }
 0x2e7   :  { %988 = vmatpush.bf16.msra.mxu2 %v1501_v27 }
 0x2e9   :  { %1147 = vmatpush.bf16.msrb.mxu0 %v1742_v33 }
 0x2eb   :  { %989 = vmatpush.bf16.msra.mxu2 %v1493_v43  ;;  %v1749_v43 = vld [vmem:[%s2361_s16 + $0x68] sm:$0xff] }
 0x2ed   :  { %1148 = vmatpush.bf16.msrb.mxu0 %v1741_v40 }
 0x359   :  { %v667_v57 = vpop.f32.mrf.mxu2 }
 0x35a   :  { %v668_v62 = vadd.f32 %v1765_v44, %v667_v57  ;;  %v1568_v44 = vld [vmem:[%s2358_s14 + $0xc0] sm:$0xf]  ;;  %v1485_v57 = vor.u32 %v1706_v54, %v1482_v55  ;;  %v1746_v54 = vld [vmem:[%s2361_s16 + $0x50] sm:$0xff] }
 0x35b   :  { %v1569_v48 = vor.u32 %v1729_v45, %v1568_v44  ;;  %v1739_v44 = vld [vmem:[%s2361_s16 + $0x18] sm:$0xff]  ;;  %v1748_v45 = vld [vmem:[%s2361_s16 + $0x60] sm:$0xff] }
 0x35c   :  { %1778 = vtanh.f32 %v668_v62  ;;  %v1565_v62 = vor.u32 %v1726_v59, %v1562_v60  ;;  %990 = vmatpush.bf16.msra.mxu2 %v1485_v57  ;;  %v1736_v55 = vld [vmem:[%s2361_s16] sm:$0xff]  ;;  %v1745_v57 = vld [vmem:[%s2361_s16 + $0x48] sm:$0xff] }
 0x35d   :  { %974 = vmatpush.bf16.msra.mxu1 %v1569_v48  ;;  %v1744_v60 = vld [vmem:[%s2361_s16 + $0x40] sm:$0xff] }
 0x360   :  { %991 = vmatpush.bf16.msra.mxu2 %v1477_v5  ;;  %v794_v5 = vperm.slane %v792_v4, 0 }
 0x361   :  { %v669_v11 = vpop.f32.mrf.mxu2  ;;  %975 = vmatpush.bf16.msra.mxu1 %v1561_v61 }
 0x362   :  { %v1779_v13 = vpop.eup %1778  ;;  %v1554_v11 = vld [vmem:[%s2358_s14 + $0xa8] sm:$0xf0] }
 0x363   :  { %v672_v15 = vpack.c.bf16 %v1779_v13, %v1779_v13  ;;  %v1557_v13 = vor.u32 %v1724_v8, %v1554_v11  ;;  %v795_v8 = vperm.slane %v792_v4, 1 }
 0x365   :  { %1467 = vmatmul.msk.bf16.vlgmr.msra.gmra.mxu3 %vm654_vm6, %v672_v15  ;;  %976 = vmatpush.bf16.msra.mxu1 %v1553_v10  ;;  %v1723_v15 = vld [vmem:[%s2358_s14 + $0x94] sm:$0xf0] }
 0x366   :  { %997 = vmatpush.bf16.msra.mxu3 %v1597_v14  ;;  %v1544_v14 = vld [vmem:[%s2358_s14 + $0x90] sm:$0xf] }
 0x367   :  { %v1545_v17 = vor.u32 %v1723_v15, %v1544_v14 }
 0x369   :  { %977 = vmatpush.bf16.msra.mxu1 %v1545_v17 }
 0x36a   :  { %998 = vmatpush.bf16.msra.mxu3 %v1589_v21  ;;  %v1721_v21 = vld [vmem:[%s2358_s14 + $0x84] sm:$0xf0] }
 0x36b   :  { %v1537_v23 = vor.u32 %v1721_v21, %v1536_v20  ;;  %v1767_v20 = vld [vmem:[%s2360_s17] ss:$0 sm:$0xff] }
 0x36d   :  { %978 = vmatpush.bf16.msra.mxu1 %v1537_v23 }
 0x36e   :  { %999 = vmatpush.bf16.msra.mxu3 %v1581_v35 }
 0x371   :  { %1159 = vmatpush.bf16.msrb.mxu1 %v1751_v39 }
 0x372   :  { %1000 = vmatpush.bf16.msra.mxu3 %v1573_v52  ;;  %v1737_v52 = vld [vmem:[%s2361_s16 + $0x8] sm:$0xff] }
 0x375   :  { %1469 = vmatmul.msk.bf16.vlgmr.msrb.gmra.mxu3 %vm722_vm7, %v710_v42  ;;  %v739_v42 = vpop.f32.mrf.mxu2  ;;  %1160 = vmatpush.bf16.msrb.mxu1 %v1750_v41 }
 0x376   :  { %v740_v47 = vadd.f32 %v739_v42, %v714_v36  ;;  %1001 = vmatpush.bf16.msra.mxu3 %v1565_v62  ;;  %v1740_v42 = vld [vmem:[%s2361_s16 + $0x20] sm:$0xff] }
 0x377   :  { %1149 = vmatpush.bf16.msrb.mxu0 %v1740_v42 }
 0x378   :  { %1780 = vtanh.f32 %v740_v47 }
 0x379   :  { %1161 = vmatpush.bf16.msrb.mxu1 %v1749_v43 }
 0x37a   :  { %1002 = vmatpush.bf16.msra.mxu3 %v1557_v13 }
 0x37b   :  { %1150 = vmatpush.bf16.msrb.mxu0 %v1739_v44 }
 0x37d   :  { %v741_v2 = vpop.f32.mrf.mxu2  ;;  %1162 = vmatpush.bf16.msrb.mxu1 %v1748_v45 }
 0x37e   :  { %v1781_v9 = vpop.eup %1780  ;;  %1003 = vmatpush.bf16.msra.mxu3 %v1549_v19 }
 0x37f   :  { %v758_v12 = vpack.c.bf16 %v1781_v9, %v1781_v9  ;;  %1151 = vmatpush.bf16.msrb.mxu0 %v1738_v49 }
 0x381   :  { %966 = vmatmul.bf16.vlgmr.msra.gmra.mxu0 %v758_v12  ;;  %992 = vmatmul.bf16.vlgmr.msra.gmra.mxu2 %v758_v12 }
 0x382   :  { %1004 = vmatpush.bf16.msra.mxu3 %v1541_v25  ;;  %1163 = vmatpush.bf16.msrb.mxu1 %v1747_v50 }
 0x383   :  { %1152 = vmatpush.bf16.msrb.mxu0 %v1737_v52 }
 0x386   :  { %1164 = vmatpush.bf16.msrb.mxu1 %v1746_v54 }
 0x387   :  { %1153 = vmatpush.bf16.msrb.mxu0 %v1736_v55 }
 0x38a   :  { %1165 = vmatpush.bf16.msrb.mxu1 %v1745_v57 }
 0x38e   :  { %1166 = vmatpush.bf16.msrb.mxu1 %v1744_v60 }
 0x3e8   :  { %v705_v27 = vpop.f32.mrf.mxu3 }
 0x3e9   :  { %v2280_v28 = vadd.f32 %v1766_v26, %v705_v27 }
 0x3eb   :  { %1217 = vrot.lane.b32.xlu2 %v2280_v28, %s1799_s19 }
 0x3f0   :  { %v707_v29 = vpop.f32.mrf.mxu3 }
 0x3f8   :  { %v752_v31 = vpop.f32.mrf.mxu3 }
 0x3f9   :  { %v753_v32 = vadd.f32 %v752_v31, %v715_v30 }
 0x3fb   :  { %1782 = vtanh.f32 %v753_v32 }
 0x3fc   :  { %1784 = vrcp.f32 %v1800_v51 }
 0x3fe   :  { %v967_v46 = vpop.f32.mrf.mxu0 }
 0x3ff   :  { %v968_v6 = vadd.f32 %v967_v46, %v794_v5 }
 0x400   :  { %v754_v34 = vpop.f32.mrf.mxu3 }
 0x401   :  { %v1783_v35 = vpop.eup %1782 }
 0x402   :  { %v759_v36 = vpack.c.bf16 %v1783_v35, %v1783_v35  ;;  %v1785_v56 = vpop.eup %1784 }
 0x403   :  { %v1174_v58 = vmul.f32 6.0, %v1785_v56  ;;  %vm1178_vm8 = vweird.f32 %v1785_v56 }
 0x404   :  { %979 = vmatmul.bf16.vlgmr.msra.gmra.mxu1 %v759_v36  ;;  %1005 = vmatmul.bf16.vlgmr.msra.gmra.mxu3 %v759_v36  ;;  %v993_v47 = vpop.f32.mrf.mxu2 }
 0x405   :  { %v1175_v59 = vsub.f32 1.0, %v1174_v58  ;;  %v994_v11 = vadd.f32 %v993_v47, %v795_v8 }
 0x406   :  { %v969_v48 = vpop.f32.mrf.mxu0 }
 0x407   :  { %v1176_v61 = vmul.f32 %v1785_v56, %v1175_v59 }
 0x409   :  { %v1177_v62 = vadd.f32 %v1785_v56, %v1176_v61 }
 0x40b   :  { %v1179_v0 = vsel %vm1178_vm8, %v1785_v56, %v1177_v62 }
 0x40c   :  { %v995_v53 = vpop.f32.mrf.mxu2  ;;  %v1180_v1 = vmul.f32 %v1179_v0, %v1172_v63 }
 0x40e   :  { %v1181_v3 = vmul.f32 1.442695, %v1180_v1 }
 0x410   :  { %1786 = vpow2.f32 %v1181_v3 }
 0x416   :  { %v1787_v2 = vpop.eup %1786 }
 0x417   :  { %v1183_v7 = vsub.f32 1.0, %v1787_v2 }
 0x419   :  { %1186 = vperm.xlu0 %1763, %v1183_v7  }
 0x445   :  { %v1218_v30 = vpop.permute.xlu2 %1217 }
 0x481   :  { %v980_v9 = vpop.f32.mrf.mxu1 }
 0x482   :  { %v981_v10 = vadd.f32 %v980_v9, %v968_v6 }
 0x484   :  { %1788 = vtanh.f32 %v981_v10 }
 0x487   :  { %v1006_v38 = vpop.f32.mrf.mxu3 }
 0x488   :  { %v1007_v12 = vadd.f32 %v1006_v38, %v994_v11 }
 0x489   :  { %v982_v13 = vpop.f32.mrf.mxu1 }
 0x48a   :  { %v1789_v14 = vpop.eup %1788  ;;  %1790 = vtanh.f32 %v1007_v12 }
 0x48b   :  { %v1012_v15 = vpack.c.bf16 %v1789_v14, %v1789_v14  ;;  %v1187_v23 = vpop.permute.xlu0 %1186 }
 0x48d   :  { %1154 = vmatmul.bf16.vlgmr.msrb.gmra.mxu0 %v1012_v15 }
 0x48f   :  { %v1008_v16 = vpop.f32.mrf.mxu3 }
 0x490   :  { %v1791_v17 = vpop.eup %1790 }
 0x491   :  { %v1013_v18 = vpack.c.bf16 %v1791_v17, %v1791_v17 }
 0x493   :  { %1167 = vmatmul.bf16.vlgmr.msrb.gmra.mxu1 %v1013_v18 }
 0x50a   :  { %v1155_v19 = vpop.f32.mrf.mxu0 }
 0x50b   :  { %v1156_v21 = vadd.f32 %v1767_v20, %v1155_v19 }
 0x510   :  { %v1168_v22 = vpop.f32.mrf.mxu1 }
 0x511   :  { %v1169_v24 = vadd.f32 %v1168_v22, %v1156_v21 }
 0x512   :  { %v1157_v25 = vpop.f32.mrf.mxu0 }
 0x513   :  { %v1189_v26 = vmul.f32 %v1187_v23, %v1169_v24 }
 0x515   :  { %1219 = vrot.lane.b32.xlu1 %v1189_v26, %s1799_s19  ;;  %1662 = vmatpush.xpose.msk.msrb.mxu2 %vm1190_vm9, %v1189_v26 }
 0x518   :  { %v1170_v27 = vpop.f32.mrf.mxu1  ;;  %1663 = vmatmul.msk.f32.vlgmr.msrb.gmra.mxu2 %vm1190_vm9, %v2280_v28 }
 0x587   :  { %v1220_v29 = vpop.permute.xlu1 %1219 }
 0x588   :  { %1664 = vmatpush.xpose.msk.msrb.mxu3 %vm1190_vm9, %v1220_v29 }
 0x58b   :  { %1665 = vmatmul.msk.f32.vlgmr.msrb.gmra.mxu3 %vm1190_vm9, %v1218_v30 }
 0x59b   :  { %v1214_v32 = vpop.f32.mrf.mxu2 }
 0x60e   :  { %v1242_v31 = vpop.f32.mrf.mxu3 }
 0x60f   :  { %1246 = vrot.lane.b32.xlu1 %v1242_v31, %s1801_s22 }
 0x681   :  { %v1247_v34 = vpop.permute.xlu1 %1246 }
 0x682   :  { %v1250_v35 = vsel %vm1249_vm10, %v1214_v32, %v1247_v34 }
 0x683   :  { %1252 = vst.msk [vmem:[%s2363_s18] sm:$0x3] %vm1251_vm11, %v1250_v35 }

</bundles_post_ra>
